<compile_context>
chip_gen: v7x
topology: tpu7x:2x2x1
jax: 0.10.0
libtpu: 0.0.40
codegen_flags: <defaults>
</compile_context>

<pallas_src>
import numpy as np
import jax
import jax.numpy as jnp
from jax.experimental import pallas as pl
from jax.experimental.pallas import tpu as pltpu

_HALF_LOG_2PI = 0.5 * float(np.log(2.0 * np.pi))


def _round_up(x, m):
    return (x + m - 1) // m * m


def _vmem_limit_bytes():
    """Generation-aware scoped-VMEM limit (75% of physical, capped)."""
    cap = 64 * 1024 * 1024
    try:
        info = pltpu.get_tpu_info()
        cap = int(getattr(info, "vmem_capacity_bytes", 0)) or cap
    except Exception:
        pass
    return min(cap * 3 // 4, 100 * 1024 * 1024)


def _choose_batch_tiling(b, n_total, x_elem_bytes, x_budget_bytes):
    """Pick (bm, b_pad, n_tiles): biggest batch tile that fits the budget,
    minimal padding (never the old round-up-to-512 waste)."""
    per_row = 2 * n_total * x_elem_bytes + 16        # double-buffered x + wb row
    max_rows = max(8, x_budget_bytes // max(per_row, 1))
    if b <= max_rows:
        # One batch tile; block == full array dim, so no (8,128) constraint and
        # no batch padding (works even for B=2).
        return b, b, 1
    bm_max = max(8, min(1024, (max_rows // 8) * 8))
    n_tiles = -(-b // bm_max)                        # ceil
    bm = _round_up(-(-b // n_tiles), 8)              # minimal tile, sublane-aligned
    return bm, bm * n_tiles, n_tiles


def _make_nll_kernel(n_levels):
    def kernel(*refs):
        x_refs = refs[:n_levels]                     # (bm, N_i), native dtype
        p_refs = refs[n_levels:2 * n_levels]         # (2, N_i) f32: [loc; inv_var]
        wb_ref = refs[2 * n_levels]                  # (bm, 2)  f32: [w, bias]
        out_ref = refs[2 * n_levels + 1]             # (1, 1, 128) f32 partial

        q = None
        for x_ref, p_ref in zip(x_refs, p_refs):
            x = x_ref[...].astype(jnp.float32)
            loc = p_ref[0:1, :]                      # (1, N_i), broadcast over rows
            ivar = p_ref[1:2, :]                     # (1, N_i)
            d = x - loc
            qi = jnp.sum(d * d * ivar, axis=-1, keepdims=True)   # (bm, 1)
            q = qi if q is None else q + qi

        w = wb_ref[:, 0:1]                           # 0.5/B (0 for padded rows)
        bias = wb_ref[:, 1:2]                        # -(C_const + sldj)/B (0 padded)
        total = jnp.sum(w * q + bias, axis=0, keepdims=True)     # (1, 1)
        out_ref[...] = jnp.broadcast_to(total[:, :, None], out_ref.shape)

    return kernel


def nll_loss_vf(gaussian_params, z_levels, sldj, input_dim, k=256):
    """JAX/Pallas equivalent of NLLLossVF.forward.

    gaussian_params: list of (loc, scale) per level, each shaped (C_i, H_i, W_i)
                     (diagonal Normal priors, broadcast over the batch).
    z_levels:        list of arrays [l1, l2, l3], each (B, C_i, H_i, W_i).
    sldj:            (B,) sum of log-determinants of Jacobians.
    input_dim:       tuple, e.g. (B, C, H, W) of the original input.
    """
    n_levels = len(z_levels)
    b = z_levels[0].shape[0]

    # Native-dtype, copy-free reshapes (no concat, no pad, no upcast).
    xs = [z.reshape(b, -1) for z in z_levels]
    n_sizes = [int(x.shape[1]) for x in xs]
    n_total = sum(n_sizes)
    x_elem_bytes = max(jnp.dtype(x.dtype).itemsize for x in xs)

    # Parameter-sized precompute (no batch dimension): packed (loc; 1/scale^2)
    # per level, plus the x-independent log-prob constant.
    params = []
    log_scale_sum = jnp.float32(0.0)
    for loc, scale in gaussian_params:
        loc_f = loc.reshape(-1).astype(jnp.float32)
        scale_f = scale.reshape(-1).astype(jnp.float32)
        inv_var = 1.0 / (scale_f * scale_f)
        params.append(jnp.stack([loc_f, inv_var], axis=0))      # (2, N_i)
        log_scale_sum = log_scale_sum + jnp.sum(jnp.log(scale_f))

    c_const = (-log_scale_sum
               - float(n_total) * _HALF_LOG_2PI
               - float(np.log(float(k)) * float(np.prod(input_dim[1:]))))

    vmem_limit = _vmem_limit_bytes()
    x_budget = int(vmem_limit * 0.6)
    bm, b_pad, n_tiles = _choose_batch_tiling(b, n_total, x_elem_bytes, x_budget)

    # Batch padding only happens when b needs >1 tile and isn't tile-divisible;
    # padded rows are neutralized by w = bias = 0 (x padded with zeros -> q finite).
    if b_pad > b:
        xs = [jnp.pad(x, ((0, b_pad - b), (0, 0))) for x in xs]

    inv_b = 1.0 / float(b)
    w_col = jnp.full((b,), 0.5 * inv_b, dtype=jnp.float32)
    bias_col = -(c_const + sldj.astype(jnp.float32)) * inv_b
    wb = jnp.stack([w_col, bias_col], axis=1)                    # (b, 2)
    if b_pad > b:
        wb = jnp.pad(wb, ((0, b_pad - b), (0, 0)))

    in_specs = (
        [pl.BlockSpec((bm, n_i), lambda bi: (bi, 0)) for n_i in n_sizes]      # x_i
        + [pl.BlockSpec((2, n_i), lambda bi: (0, 0)) for n_i in n_sizes]      # params_i
        + [pl.BlockSpec((bm, 2), lambda bi: (bi, 0))]                         # wb
    )
    out_spec = pl.BlockSpec((1, 1, 128), lambda bi: (bi, 0, 0))

    out = pl.pallas_call(
        _make_nll_kernel(n_levels),
        out_shape=jax.ShapeDtypeStruct((n_tiles, 1, 128), jnp.float32),
        grid_spec=pltpu.PrefetchScalarGridSpec(
            num_scalar_prefetch=0,
            grid=(n_tiles,),
            in_specs=in_specs,
            out_specs=out_spec,
        ),
        compiler_params=pltpu.CompilerParams(
            dimension_semantics=("parallel",),       # batch tiles -> both TCs on v7x
            vmem_limit_bytes=vmem_limit,
        ),
        cost_estimate=pl.CostEstimate(
            flops=4 * b_pad * n_total,
            transcendentals=0,
            bytes_accessed=(b_pad * n_total * x_elem_bytes
                            + 2 * n_total * 4 + b_pad * 8 + n_tiles * 512),
        ),
    )(*xs, *params, wb)

    # Tiny finalize: one scalar per batch tile.
    return jnp.sum(out[:, 0, 0])


def _reference_nll(gaussian_params, z_levels, sldj, input_dim, k=256):
    """Pure-JAX reference mirroring torch.distributions.Normal.log_prob."""
    def lp(x, loc, scale):
        zs = (x.astype(jnp.float32) - loc[None]) / scale[None]
        logp = -0.5 * zs * zs - jnp.log(scale[None]) - _HALF_LOG_2PI
        return jnp.sum(logp, axis=(1, 2, 3))

    totals = [lp(x, l.astype(jnp.float32), s.astype(jnp.float32))
              for x, (l, s) in zip(z_levels, gaussian_params)]
    prior_ll = sum(totals) - np.log(float(k)) * float(np.prod(input_dim[1:]))
    return -jnp.mean(prior_ll + sldj.astype(jnp.float32))


if __name__ == "__main__":
    key = jax.random.PRNGKey(0)
    B = 2
    # Multi-scale latent shapes (NCHW), as produced by a typical flow model.
    level_shapes = [(B, 4, 16, 16), (B, 8, 8, 8), (B, 16, 4, 4)]
    input_dim = (B, 3, 32, 32)
    k_const = 256

    keys = jax.random.split(key, 10)
    z_levels = []
    gaussian_params = []
    for i, shp in enumerate(level_shapes):
        z_levels.append(jax.random.normal(keys[i], shp, dtype=jnp.float32))
        loc = 0.1 * jax.random.normal(keys[3 + i], shp[1:], dtype=jnp.float32)
        scale = 0.5 + jax.nn.softplus(
            0.1 * jax.random.normal(keys[6 + i], shp[1:], dtype=jnp.float32)
        )
        gaussian_params.append((loc, scale))
    sldj = jax.random.normal(keys[9], (B,), dtype=jnp.float32)

    nll = nll_loss_vf(gaussian_params, z_levels, sldj, input_dim, k=k_const)
    nll = jax.block_until_ready(nll)

    ref = _reference_nll(gaussian_params, z_levels, sldj, input_dim, k=k_const)
    ref = jax.block_until_ready(ref)

    assert np.allclose(np.asarray(nll), np.asarray(ref), rtol=1e-5, atol=1e-3), (
        f"mismatch: pallas={nll} ref={ref}"
    )
    print("KERNEL_OK")
</pallas_src>

<mosaic_0001>
module attributes {stable_mosaic.version = 11 : i64} {
  func.func @kernel(%arg0: i32, %arg1: memref<2x1024xf32, #tpu.memory_space<vmem>>, %arg2: memref<2x512xf32, #tpu.memory_space<vmem>>, %arg3: memref<2x256xf32, #tpu.memory_space<vmem>>, %arg4: memref<2x1024xf32, #tpu.memory_space<vmem>>, %arg5: memref<2x512xf32, #tpu.memory_space<vmem>>, %arg6: memref<2x256xf32, #tpu.memory_space<vmem>>, %arg7: memref<2x2xf32, #tpu.memory_space<vmem>>, %arg8: memref<1x1x128xf32, #tpu.memory_space<vmem>>) attributes {dimension_semantics = [#tpu.dimension_semantics<parallel>], iteration_bounds = array<i64: 1>, scalar_prefetch = 0 : i64, scratch_operands = 0 : i64, tpu.core_type = #tpu.core_type<tc>, window_params = [{transform_indices = @transform_0, window_bounds = array<i64: 2, 1024>}, {transform_indices = @transform_1, window_bounds = array<i64: 2, 512>}, {transform_indices = @transform_2, window_bounds = array<i64: 2, 256>}, {pipeline_mode = #tpu.pipeline_mode<synchronous>, transform_indices = @transform_3, window_bounds = array<i64: 2, 1024>}, {pipeline_mode = #tpu.pipeline_mode<synchronous>, transform_indices = @transform_4, window_bounds = array<i64: 2, 512>}, {pipeline_mode = #tpu.pipeline_mode<synchronous>, transform_indices = @transform_5, window_bounds = array<i64: 2, 256>}, {transform_indices = @transform_6, window_bounds = array<i64: 2, 2>}, {transform_indices = @transform_7, window_bounds = array<i64: 1, 1, 128>}]} {
    %c0 = arith.constant 0 : index
    %c0_0 = arith.constant 0 : index
    %0 = vector.load %arg1[%c0, %c0_0] : memref<2x1024xf32, #tpu.memory_space<vmem>>, vector<2x1024xf32>
    %c0_1 = arith.constant 0 : index
    %c0_2 = arith.constant 0 : index
    %1 = vector.load %arg4[%c0_1, %c0_2] : memref<2x1024xf32, #tpu.memory_space<vmem>>, vector<1x1024xf32>
    %c1 = arith.constant 1 : index
    %c0_3 = arith.constant 0 : index
    %2 = vector.load %arg4[%c1, %c0_3] : memref<2x1024xf32, #tpu.memory_space<vmem>>, vector<1x1024xf32>
    %3 = vector.broadcast %1 : vector<1x1024xf32> to vector<2x1024xf32>
    %4 = arith.subf %0, %3 : vector<2x1024xf32>
    %5 = arith.mulf %4, %4 : vector<2x1024xf32>
    %6 = vector.broadcast %2 : vector<1x1024xf32> to vector<2x1024xf32>
    %7 = arith.mulf %5, %6 : vector<2x1024xf32>
    %cst = arith.constant dense<0.000000e+00> : vector<2xf32>
    %8 = vector.multi_reduction <add>, %7, %cst [1] : vector<2x1024xf32> to vector<2xf32>
    %9 = vector.shape_cast %8 : vector<2xf32> to vector<2x1xf32>
    %c0_4 = arith.constant 0 : index
    %c0_5 = arith.constant 0 : index
    %10 = vector.load %arg2[%c0_4, %c0_5] : memref<2x512xf32, #tpu.memory_space<vmem>>, vector<2x512xf32>
    %c0_6 = arith.constant 0 : index
    %c0_7 = arith.constant 0 : index
    %11 = vector.load %arg5[%c0_6, %c0_7] : memref<2x512xf32, #tpu.memory_space<vmem>>, vector<1x512xf32>
    %c1_8 = arith.constant 1 : index
    %c0_9 = arith.constant 0 : index
    %12 = vector.load %arg5[%c1_8, %c0_9] : memref<2x512xf32, #tpu.memory_space<vmem>>, vector<1x512xf32>
    %13 = vector.broadcast %11 : vector<1x512xf32> to vector<2x512xf32>
    %14 = arith.subf %10, %13 : vector<2x512xf32>
    %15 = arith.mulf %14, %14 : vector<2x512xf32>
    %16 = vector.broadcast %12 : vector<1x512xf32> to vector<2x512xf32>
    %17 = arith.mulf %15, %16 : vector<2x512xf32>
    %cst_10 = arith.constant dense<0.000000e+00> : vector<2xf32>
    %18 = vector.multi_reduction <add>, %17, %cst_10 [1] : vector<2x512xf32> to vector<2xf32>
    %19 = vector.shape_cast %18 : vector<2xf32> to vector<2x1xf32>
    %20 = arith.addf %9, %19 : vector<2x1xf32>
    %c0_11 = arith.constant 0 : index
    %c0_12 = arith.constant 0 : index
    %21 = vector.load %arg3[%c0_11, %c0_12] : memref<2x256xf32, #tpu.memory_space<vmem>>, vector<2x256xf32>
    %c0_13 = arith.constant 0 : index
    %c0_14 = arith.constant 0 : index
    %22 = vector.load %arg6[%c0_13, %c0_14] : memref<2x256xf32, #tpu.memory_space<vmem>>, vector<1x256xf32>
    %c1_15 = arith.constant 1 : index
    %c0_16 = arith.constant 0 : index
    %23 = vector.load %arg6[%c1_15, %c0_16] : memref<2x256xf32, #tpu.memory_space<vmem>>, vector<1x256xf32>
    %24 = vector.broadcast %22 : vector<1x256xf32> to vector<2x256xf32>
    %25 = arith.subf %21, %24 : vector<2x256xf32>
    %26 = arith.mulf %25, %25 : vector<2x256xf32>
    %27 = vector.broadcast %23 : vector<1x256xf32> to vector<2x256xf32>
    %28 = arith.mulf %26, %27 : vector<2x256xf32>
    %cst_17 = arith.constant dense<0.000000e+00> : vector<2xf32>
    %29 = vector.multi_reduction <add>, %28, %cst_17 [1] : vector<2x256xf32> to vector<2xf32>
    %30 = vector.shape_cast %29 : vector<2xf32> to vector<2x1xf32>
    %31 = arith.addf %20, %30 : vector<2x1xf32>
    %c0_18 = arith.constant 0 : index
    %c0_19 = arith.constant 0 : index
    %32 = vector.load %arg7[%c0_18, %c0_19] : memref<2x2xf32, #tpu.memory_space<vmem>>, vector<2x1xf32>
    %c0_20 = arith.constant 0 : index
    %c1_21 = arith.constant 1 : index
    %33 = vector.load %arg7[%c0_20, %c1_21] : memref<2x2xf32, #tpu.memory_space<vmem>>, vector<2x1xf32>
    %34 = arith.mulf %32, %31 : vector<2x1xf32>
    %35 = arith.addf %34, %33 : vector<2x1xf32>
    %cst_22 = arith.constant dense<0.000000e+00> : vector<1xf32>
    %36 = vector.multi_reduction <add>, %35, %cst_22 [0] : vector<2x1xf32> to vector<1xf32>
    %37 = vector.shape_cast %36 : vector<1xf32> to vector<1x1xf32>
    %38 = vector.shape_cast %37 : vector<1x1xf32> to vector<1x1x1xf32>
    %39 = vector.shape_cast %38 : vector<1x1x1xf32> to vector<1x1x1xf32>
    %40 = vector.broadcast %39 : vector<1x1x1xf32> to vector<1x1x128xf32>
    %c0_23 = arith.constant 0 : index
    %c0_24 = arith.constant 0 : index
    %c0_25 = arith.constant 0 : index
    %41 = vector.load %arg8[%c0_23, %c0_24, %c0_25] : memref<1x1x128xf32, #tpu.memory_space<vmem>>, vector<1x1x128xf32>
    tpu.vector_store %arg8[%c0_23, %c0_24, %c0_25], %40 {strides = array<i32>} : memref<1x1x128xf32, #tpu.memory_space<vmem>>, vector<1x1x128xf32>,
    return
  }
  func.func @transform_0(%arg0: i32) -> (i32, i32) {
    %c0_i32 = arith.constant 0 : i32
    %c0_i32_0 = arith.constant 0 : i32
    return %arg0, %c0_i32 : i32, i32
  }
  func.func @transform_1(%arg0: i32) -> (i32, i32) {
    %c0_i32 = arith.constant 0 : i32
    %c0_i32_0 = arith.constant 0 : i32
    return %arg0, %c0_i32 : i32, i32
  }
  func.func @transform_2(%arg0: i32) -> (i32, i32) {
    %c0_i32 = arith.constant 0 : i32
    %c0_i32_0 = arith.constant 0 : i32
    return %arg0, %c0_i32 : i32, i32
  }
  func.func @transform_3(%arg0: i32) -> (i32, i32) {
    %c0_i32 = arith.constant 0 : i32
    %c0_i32_0 = arith.constant 0 : i32
    %c0_i32_1 = arith.constant 0 : i32
    return %c0_i32, %c0_i32_0 : i32, i32
  }
  func.func @transform_4(%arg0: i32) -> (i32, i32) {
    %c0_i32 = arith.constant 0 : i32
    %c0_i32_0 = arith.constant 0 : i32
    %c0_i32_1 = arith.constant 0 : i32
    return %c0_i32, %c0_i32_0 : i32, i32
  }
  func.func @transform_5(%arg0: i32) -> (i32, i32) {
    %c0_i32 = arith.constant 0 : i32
    %c0_i32_0 = arith.constant 0 : i32
    %c0_i32_1 = arith.constant 0 : i32
    return %c0_i32, %c0_i32_0 : i32, i32
  }
  func.func @transform_6(%arg0: i32) -> (i32, i32) {
    %c0_i32 = arith.constant 0 : i32
    %c0_i32_0 = arith.constant 0 : i32
    return %arg0, %c0_i32 : i32, i32
  }
  func.func @transform_7(%arg0: i32) -> (i32, i32, i32) {
    %c0_i32 = arith.constant 0 : i32
    %c0_i32_0 = arith.constant 0 : i32
    %c0_i32_1 = arith.constant 0 : i32
    return %arg0, %c0_i32, %c0_i32_0 : i32, i32, i32
  }
}

</mosaic_0001>

<bundles_post_ra>
// kernel: tpu_custom_call.1
= control target key start
LH: loop header
LB: loop body
LE: loop exit
PB: predicated region body
PF: predicated region fallthrough
CT: control target
= control target key end

     0   :  { %12 = vsyncpa [#allocation3], 0  ;;  %s761_s0 = inlined_call_operand.hbm [shape: f32[2,1024], index: 0, kind: input, shape index: {}]   ;;  %s762_s1 = inlined_call_operand.hbm [shape: f32[2,512], index: 1, kind: input, shape index: {}]   ;;  %s763_s2 = inlined_call_operand.vmem [shape: f32[2,256], index: 2, kind: input, shape index: {}]   ;;  %s764_s3 = inlined_call_operand.hbm [shape: f32[2,1024], index: 3, kind: input, shape index: {}]   ;;  %s765_s4 = inlined_call_operand.vmem [shape: f32[2,512], index: 4, kind: input, shape index: {}]   ;;  %s766_s5 = inlined_call_operand.vmem [shape: f32[2,256], index: 5, kind: input, shape index: {}]   ;;  %s767_s6 = inlined_call_operand.vmem [shape: f32[2,2], index: 6, kind: input, shape index: {}]   ;;  %s768_s7 = inlined_call_operand.hbm [shape: f32[1,1,128], index: 7, kind: output, shape index: {}]  }
   0x1   :  { %13 = vsyncpa [#allocation6], 0 }
   0x2   :  { %14 = vsyncpa [#allocation4], 0  ;;  %s583_s24 = smov [#allocation5]   ;;  %s584_s26 = smov [#allocation2]  }
   0x3   :  { %s31_s25 = sshll.u32 %s583_s24, 4  ;;  %s21_s27 = sshll.u32 %s584_s26, 4  ;;  %s32_s25 = int_to_ptr.vmem [resolvable:$true] %s31_s25  ;;  %s22_s27 = int_to_ptr.vmem [resolvable:$true] %s21_s27 }
   0x4   :  { %s489_s30 = scalar_lea.hbm %s762_s1, 128 }
   0x5   :  { %p490_p0 = scmp.ne.s32.totalorder %s762_s1, %s489_s30  ;;  %p493_p1 = scmp.lt.u32.totalorder %s489_s30, %s762_s1 }
   0x7   :  { %p495_p2 = pnand %p493_p1, %p490_p0 }
   0x9   :  { %498 = shalt.err (!%p495_p2)
}
   0xa   :  { %s499_s12 = scalar_lea.vmem %s32_s25, 128  ;;  %p504_p4 = scmp.lt.s32.totalorder %s32_s25, %s32_s25 }
   0xb   :  { %p500_p3 = scmp.ne.s32.totalorder %s32_s25, %s499_s12  ;;  %p505_p5 = scmp.lt.s32.totalorder %s499_s12, %s499_s12 }
   0xd   :  { %p506_p6 = por %p505_p5, %p504_p4 }
   0xf   :  { %p507_p7 = pnand %p506_p6, %p500_p3 }
  0x11   :  { %510 = shalt.err (!%p507_p7)
}
  0x12   :  { %34 = dma.hbm_to_vmem [thread:$0]  %s762_s1, 128, %s32_s25, [#allocation6]  }
  0x13   :  { %s511_s17 = scalar_lea.hbm %s761_s0, 256 }
  0x14   :  { %p512_p8 = scmp.ne.s32.totalorder %s761_s0, %s511_s17  ;;  %p515_p9 = scmp.lt.u32.totalorder %s511_s17, %s761_s0 }
  0x16   :  { %p517_p10 = pnand %p515_p9, %p512_p8 }
  0x18   :  { %520 = shalt.err (!%p517_p10)
}
  0x19   :  { %s521_s22 = scalar_lea.vmem %s22_s27, 256  ;;  %p526_p12 = scmp.lt.s32.totalorder %s22_s27, %s22_s27 }
  0x1a   :  { %p522_p11 = scmp.ne.s32.totalorder %s22_s27, %s521_s22  ;;  %p527_p13 = scmp.lt.s32.totalorder %s521_s22, %s521_s22 }
  0x1c   :  { %p528_p0 = por %p527_p13, %p526_p12 }
  0x1e   :  { %p529_p1 = pnand %p528_p0, %p522_p11 }
  0x20   :  { %532 = shalt.err (!%p529_p1)
}
  0x21   :  { %24 = dma.hbm_to_vmem [thread:$0]  %s761_s0, 256, %s22_s27, [#allocation3]  }
  0x22   :  { %s585_s24 = smov [#allocation7]   ;;  %s533_s29 = scalar_lea.hbm %s764_s3, 256 }
  0x23   :  { %s43_s25 = sshll.u32 %s585_s24, 4  ;;  %p534_p2 = scmp.ne.s32.totalorder %s764_s3, %s533_s29  ;;  %s44_s25 = int_to_ptr.vmem [resolvable:$true] %s43_s25 }
  0x24   :  { %p537_p3 = scmp.lt.u32.totalorder %s533_s29, %s764_s3 }
  0x26   :  { %p539_p4 = pnand %p537_p3, %p534_p2 }
  0x28   :  { %542 = shalt.err (!%p539_p4)
}
  0x29   :  { %s543_s11 = scalar_lea.vmem %s44_s25, 256  ;;  %p548_p6 = scmp.lt.s32.totalorder %s44_s25, %s44_s25 }
  0x2a   :  { %p544_p5 = scmp.ne.s32.totalorder %s44_s25, %s543_s11  ;;  %p549_p7 = scmp.lt.s32.totalorder %s543_s11, %s543_s11 }
  0x2c   :  { %p550_p8 = por %p549_p7, %p548_p6 }
  0x2e   :  { %p551_p9 = pnand %p550_p8, %p544_p5 }
  0x30   :  { %554 = shalt.err (!%p551_p9)
}
  0x31   :  { %46 = dma.hbm_to_vmem [thread:$0]  %s764_s3, 256, %s44_s25, [#allocation6]  }
  0x32   :  { %577 = dma.done.wait [#allocation3], 256  }
  0x33   :  { %578 = vsyncadd [#allocation3], 4294967040 }
  0x34   :  { %579 = dma.done.wait [#allocation6], 384  }
  0x35   :  { %580 = vsyncadd [#allocation6], 4294966912  ;;  %v68_v0 = vlaneseq  ;;  %v586_v1 = vmov 1983009808   ;;  %v64_v13 = vld [vmem:[#allocation7] ss:$2 sm:$0xff] }
  0x36   :  { %v103_v2 = vunpack.c.l.s4 %v586_v1  ;;  %v66_v15 = vld [vmem:[#allocation7 + $0x1] ss:$2 sm:$0xff]  ;;  %v274_v36 = vld [vmem:[%s765_s4] ss:$2 sm:$0xf]  ;;  %vm255_vm0 = vcmask 1041408  }
  0x37   :  { %v69_v3 = vshrl.u32 %v68_v0, 7  ;;  %v62_v37 = vld [vmem:[#allocation2] sm:$0xff]  ;;  %v63_v42 = vld [vmem:[#allocation2 + $0x8] sm:$0xff]  ;;  %s587_s20 = smov 127   ;;  %vm449_vm1 = vcmask 1024  }
  0x38   :  { %v104_v4 = vunpack.c.0.s8 %v103_v2  ;;  %v479_v49 = vld [vmem:[%s765_s4 + $0x1] ss:$2 sm:$0xf]  ;;  %v383_v0 = vld [vmem:[%s766_s5] ss:$2 sm:$0x3] }
  0x39   :  { %v666_v5 = vsub.s32 0, %v69_v3  ;;  %v668_v6 = vsub.s32 1, %v69_v3  ;;  %v670_v7 = vsub.s32 2, %v69_v3  ;;  %v672_v8 = vsub.s32 3, %v69_v3 }
  0x3a   :  { %v86_v9 = vsub.s32 4, %v69_v3  ;;  %v90_v10 = vsub.s32 5, %v69_v3  ;;  %v94_v11 = vsub.s32 6, %v69_v3  ;;  %v98_v12 = vsub.s32 7, %v69_v3 }
  0x3b   :  { %v674_v14 = vsub.s32 %v104_v4, %v69_v3  ;;  %v71_v16 = vrot.slane %v64_v13, %v666_v5  ;;  %v75_v17 = vrot.slane %v64_v13, %v668_v6  ;;  %v79_v18 = vrot.slane %v64_v13, %v670_v7 }
  0x3c   :  { %v83_v19 = vrot.slane %v64_v13, %v672_v8  ;;  %v87_v20 = vrot.slane %v64_v13, %v86_v9  ;;  %v91_v21 = vrot.slane %v64_v13, %v90_v10  ;;  %v95_v22 = vrot.slane %v64_v13, %v94_v11 }
  0x3d   :  { %v99_v23 = vrot.slane %v64_v13, %v98_v12  ;;  %v100_v24 = vcombine.low %v71_v16, %v75_v17  ;;  %v144_v26 = vrot.slane %v66_v15, %v666_v5  ;;  %v148_v27 = vrot.slane %v66_v15, %v668_v6 }
  0x3e   :  { %v101_v25 = vcombine.low %v79_v18, %v83_v19  ;;  %v117_v28 = vcombine.low %v87_v20, %v91_v21  ;;  %v152_v30 = vrot.slane %v66_v15, %v670_v7  ;;  %v156_v31 = vrot.slane %v66_v15, %v672_v8  ;;  %v273_v20 = vld [vmem:[#allocation5] sm:$0xff] }
  0x3f   :  { %v118_v29 = vcombine.low %v95_v22, %v99_v23  ;;  %v108_v32 = vrot.slane %v100_v24, %v674_v14  ;;  %v160_v34 = vrot.slane %v66_v15, %v86_v9  ;;  %v164_v35 = vrot.slane %v66_v15, %v90_v10 }
  0x40   :  { %v115_v33 = vrot.slane %v101_v25, %v674_v14  ;;  %v125_v38 = vrot.slane %v117_v28, %v674_v14  ;;  %v168_v40 = vrot.slane %v66_v15, %v94_v11  ;;  %v172_v41 = vrot.slane %v66_v15, %v98_v12 }
  0x41   :  { %v132_v39 = vrot.slane %v118_v29, %v674_v14  ;;  %v173_v44 = vcombine.low %v144_v26, %v148_v27  ;;  %v174_v45 = vcombine.low %v152_v30, %v156_v31  ;;  %v190_v46 = vcombine.low %v160_v34, %v164_v35  ;;  %v480_v30 = vld [vmem:[%s766_s5 + $0x1] ss:$2 sm:$0x3] }
  0x42   :  { %v116_v43 = vcombine.low %v108_v32, %v115_v33  ;;  %v191_v48 = vcombine.low %v168_v40, %v172_v41  ;;  %v281_v50 = vrot.slane %v274_v36, %v666_v5  ;;  %v285_v51 = vrot.slane %v274_v36, %v668_v6 }
  0x43   :  { %v133_v47 = vcombine.low %v125_v38, %v132_v39  ;;  %v181_v53 = vrot.slane %v173_v44, %v674_v14  ;;  %v188_v54 = vrot.slane %v174_v45, %v674_v14  ;;  %v198_v55 = vrot.slane %v190_v46, %v674_v14 }
  0x44   :  { %v136_v52 = vsub.f32 %v62_v37, %v116_v43  ;;  %v205_v57 = vrot.slane %v191_v48, %v674_v14  ;;  %v289_v58 = vrot.slane %v274_v36, %v670_v7  ;;  %v293_v59 = vrot.slane %v274_v36, %v672_v8  ;;  %v382_v43 = vld [vmem:[%s763_s2] sm:$0xf] }
  0x45   :  { %v137_v56 = vsub.f32 %v63_v42, %v133_v47  ;;  %v189_v61 = vcombine.low %v181_v53, %v188_v54  ;;  %v294_v62 = vcombine.low %v281_v50, %v285_v51  ;;  %v318_v63 = vrot.slane %v479_v49, %v666_v5 }
  0x46   :  { %v138_v60 = vmul.f32 %v136_v52, %v136_v52  ;;  %v206_v2 = vcombine.low %v198_v55, %v205_v57  ;;  %v295_v3 = vcombine.low %v289_v58, %v293_v59  ;;  %v322_v4 = vrot.slane %v479_v49, %v668_v6 }
  0x47   :  { %v139_v1 = vmul.f32 %v137_v56, %v137_v56  ;;  %v302_v10 = vrot.slane %v294_v62, %v674_v14  ;;  %v326_v11 = vrot.slane %v479_v49, %v670_v7  ;;  %v330_v12 = vrot.slane %v479_v49, %v672_v8 }
  0x48   :  { %v209_v9 = vmul.f32 %v189_v61, %v138_v60  ;;  %v309_v15 = vrot.slane %v295_v3, %v674_v14  ;;  %v331_v16 = vcombine.low %v318_v63, %v322_v4  ;;  %v390_v17 = vrot.slane %v383_v0, %v666_v5 }
  0x49   :  { %v210_v13 = vmul.f32 %v206_v2, %v139_v1  ;;  %v332_v21 = vcombine.low %v326_v11, %v330_v12  ;;  %v394_v22 = vrot.slane %v383_v0, %v668_v6  ;;  %v410_v41 = vrot.slane %v480_v30, %v666_v5 }
  0x4a   :  { %v213_v18 = vcombine.high %v209_v9, %v209_v9  ;;  %v220_v19 = vrot.slane %v209_v9, %v674_v14  ;;  %v310_v25 = vcombine.low %v302_v10, %v309_v15  ;;  %v339_v7 = vrot.slane %v331_v16, %v674_v14 }
  0x4b   :  { %v230_v23 = vcombine.high %v210_v13, %v210_v13  ;;  %v237_v24 = vrot.slane %v210_v13, %v674_v14  ;;  %v346_v28 = vrot.slane %v332_v21, %v674_v14  ;;  %v395_v40 = vcombine.low %v390_v17, %v394_v22 }
  0x4c   :  { %v227_v8 = vrot.slane %v213_v18, %v674_v14  ;;  %v228_v26 = vcombine.high %v220_v19, %v220_v19  ;;  %v256_v27 = vsel %vm255_vm0, %v220_v19, 0.0  ;;  %v312_v29 = vsub.f32 %v273_v20, %v310_v25  ;;  %v442_v18 = vld [vmem:[%s767_s6] sm:$0x3]  ;;  %s589_s6 = smov [#allocation8]  }
  0x4d   :  { %v347_v34 = vcombine.low %v339_v7, %v346_v28  ;;  %v244_v35 = vrot.slane %v230_v23, %v674_v14  ;;  %v245_v36 = vcombine.high %v237_v24, %v237_v24  ;;  %v414_v44 = vrot.slane %v480_v30, %v668_v6  ;;  %s469_s21 = sshll.u32 %s589_s6, 4  ;;  %s470_s21 = int_to_ptr.vmem [resolvable:$true] %s469_s21 }
  0x4e   :  { %v229_v31 = vcombine.high %v227_v8, %v227_v8  ;;  %v257_v32 = vsel %vm255_vm0, %v228_v26, 0.0  ;;  %v259_v33 = vsel %vm255_vm0, %v227_v8, 0.0  ;;  %v313_v39 = vmul.f32 %v312_v29, %v312_v29  ;;  %s555_s22 = scalar_lea.vmem %s470_s21, 16  ;;  %s559_s1 = scalar_lea.vmem %s470_s21, 32 }
  0x4f   :  { %v258_v37 = vadd.f32 %v257_v32, %v256_v27  ;;  %v263_v45 = vsel %vm255_vm0, %v237_v24, 0.0  ;;  %v402_v47 = vrot.slane %v395_v40, %v674_v14  ;;  %v246_v48 = vcombine.high %v244_v35, %v244_v35  ;;  %p556_p10 = scmp.ne.s32.totalorder %s470_s21, %s555_s22  ;;  %p560_p11 = scmp.lt.s32.totalorder %s470_s21, %s470_s21 }
  0x50   :  { %v261_v38 = vsel %vm255_vm0, %v229_v31, 0.0  ;;  %v349_v46 = vmul.f32 %v347_v34, %v313_v39  ;;  %v415_v50 = vcombine.low %v410_v41, %v414_v44  ;;  %v265_v51 = vsel %vm255_vm0, %v245_v36, 0.0  ;;  %p561_p12 = scmp.lt.s32.totalorder %s559_s1, %s555_s22 }
  0x51   :  { %v260_v42 = vadd.f32 %v259_v33, %v258_v37  ;;  %v404_v53 = vsub.f32 %v382_v43, %v402_v47  ;;  %v267_v55 = vsel %vm255_vm0, %v244_v35, 0.0  ;;  %v269_v61 = vsel %vm255_vm0, %v246_v48, 0.0 }
  0x52   :  { %v351_v52 = vcombine.high %v349_v46, %v349_v46  ;;  %v358_v5 = vrot.slane %v349_v46, %v674_v14  ;;  %v422_v56 = vrot.slane %v415_v50, %v674_v14  ;;  %v588_v19 = vmov 0   ;;  %p562_p13 = por %p561_p12, %p560_p11 }
  0x53   :  { %v262_v49 = vadd.f32 %v261_v38, %v260_v42  ;;  %v405_v59 = vmul.f32 %v404_v53, %v404_v53  ;;  %488 = vset.pattern.permute.xlu0 %v588_v19 }
  0x54   :  { %v365_v6 = vrot.slane %v351_v52, %v674_v14  ;;  %v366_v57 = vcombine.high %v358_v5, %v358_v5  ;;  %v372_v58 = vsel %vm255_vm0, %v358_v5, 0.0  ;;  %p563_p0 = pnand %p562_p13, %p556_p10 }
  0x55   :  { %v264_v54 = vadd.f32 %v263_v45, %v262_v49  ;;  %v424_v1 = vmul.f32 %v422_v56, %v405_v59 }
  0x56   :  { %v367_v62 = vcombine.high %v365_v6, %v365_v6  ;;  %v373_v63 = vsel %vm255_vm0, %v366_v57, 0.0  ;;  %v375_v0 = vsel %vm255_vm0, %v365_v6, 0.0 }
  0x57   :  { %v266_v60 = vadd.f32 %v265_v51, %v264_v54  ;;  %v374_v3 = vadd.f32 %v373_v63, %v372_v58  ;;  %v432_v9 = vrot.slane %v424_v1, %v674_v14 }
  0x58   :  { %v377_v4 = vsel %vm255_vm0, %v367_v62, 0.0 }
  0x59   :  { %v268_v2 = vadd.f32 %v267_v55, %v266_v60  ;;  %v376_v11 = vadd.f32 %v375_v0, %v374_v3  ;;  %v433_v12 = vcombine.high %v432_v9, %v432_v9  ;;  %v436_v13 = vsel %vm255_vm0, %v432_v9, 0.0 }
  0x5b   :  { %v270_v10 = vadd.f32 %v269_v61, %v268_v2  ;;  %v378_v15 = vadd.f32 %v377_v4, %v376_v11  ;;  %v437_v16 = vsel %vm255_vm0, %v433_v12, 0.0 }
  0x5c   :  { %v438_v17 = vadd.f32 %v437_v16, %v436_v13 }
  0x5d   :  { %271 = vadd.xlane.f32.xlu0 %v270_v10 }
  0x5e   :  { %439 = vadd.xlane.f32.xlu1 %v438_v17 }
  0x61   :  { %379 = vadd.xlane.f32.xlu0 %v378_v15 }
  0x6f   :  { %445 = vrot.lane.b32.xlu1 %v442_v18, %s587_s20 }
  0xea   :  { %v272_v14 = vpop.xlane.xlu0 %271 }
  0xeb   :  { %v440_v21 = vpop.xlane.xlu1 %439 }
  0xee   :  { %v380_v20 = vpop.xlane.xlu0 %379 }
  0xef   :  { %v381_v22 = vadd.f32 %v380_v20, %v272_v14  ;;  %v446_v24 = vpop.permute.xlu1 %445 }
  0xf1   :  { %v441_v23 = vadd.f32 %v440_v21, %v381_v22 }
  0xf3   :  { %v443_v25 = vmul.f32 %v442_v18, %v441_v23 }
  0xf5   :  { %v448_v7 = vadd.f32 %v446_v24, %v443_v25 }
  0xf7   :  { %v450_v8 = vsel %vm449_vm1, %v448_v7, 0.0 }
  0xf8   :  { %v451_v26 = vrot.slane %v450_v8, 4 }
  0xfa   :  { %v452_v27 = vadd.f32 %v451_v26, %v450_v8 }
  0xfc   :  { %v453_v28 = vrot.slane %v452_v27, 2 }
  0xfe   :  { %v454_v29 = vadd.f32 %v453_v28, %v452_v27 }
 0x100   :  { %v455_v30 = vrot.slane %v454_v29, 1 }
 0x102   :  { %v456_v31 = vadd.f32 %v455_v30, %v454_v29 }
 0x104   :  { %459 = vperm.xlu0 %488, %v456_v31  }
 0x183   :  { %v460_v32 = vpop.permute.xlu0 %459 }
 0x184   :  { %462 = vst [vmem:[#allocation8] sm:$0x1] %v460_v32 }
 0x185   :  { %566 = shalt.err (!%p563_p0)
}
 0x186   :  { %s567_s25 = scalar_lea.hbm %s768_s7, 16 }
 0x187   :  { %p568_p1 = scmp.ne.s32.totalorder %s768_s7, %s567_s25  ;;  %p571_p2 = scmp.lt.u32.totalorder %s567_s25, %s768_s7 }
 0x189   :  { %p573_p3 = pnand %p571_p2, %p568_p1 }
 0x18b   :  { %576 = shalt.err (!%p573_p3)
}
 0x18c   :  { %472 = dma.vmem_to_hbm [thread:$0]  %s470_s21, 16, %s768_s7, [#allocation4]  }
 0x18d   :  { %581 = dma.done.wait [#allocation4], 16  }
 0x18e   :  { %582 = vsyncadd [#allocation4], 4294967280 }
 0x18f   :  { %476 = vsyncpa [#allocation3], 1 }
 0x190   :  { %477 = vsyncpa [#allocation6], 1 }
 0x191   :  { %478 = vsyncpa [#allocation4], 1 }

</bundles_post_ra>
